<compile_context>
chip_gen: v7x
topology: tpu7x:2x2x1
jax: 0.10.0
libtpu: 0.0.40
codegen_flags: <defaults>
</compile_context>

<pallas_src>
import functools

import jax
import jax.numpy as jnp
import numpy as np
from jax.experimental import pallas as pl
from jax.experimental.pallas import tpu as pltpu


def _bert_embeddings_kernel(
    ids_ref,    # SMEM (B*S,) int32  : scalar-prefetched word ids (DMA gather addresses)
    tok_ref,    # VMEM (TILE_R, 1) int32
    word_hbm,   # HBM  (V, H)        : full word table, never copied wholesale to VMEM
    pos_ref,    # VMEM (TILE_R, H)
    type_ref,   # VMEM (T, H)
    gamma_ref,  # VMEM (1, H)
    beta_ref,   # VMEM (1, H)
    out_ref,    # VMEM (TILE_R, H)
    wbuf,       # VMEM scratch (TILE_R, H) : gathered word rows
    sem,        # DMA semaphore (bytes from all row copies accumulate here)
    *, tile_r, n_types, eps,
):
    base = pl.program_id(0) * tile_r

    # 1) Kick off one row-gather DMA per token: word_hbm[ids[base + i]] -> wbuf[i].
    @pl.loop(0, tile_r)
    def _issue(i):
        row = ids_ref[base + i]
        pltpu.make_async_copy(
            word_hbm.at[pl.ds(row, 1)], wbuf.at[pl.ds(i, 1)], sem
        ).start()

    # 2) Overlap VPU work with the in-flight gather: position rows are streamed by
    #    the BlockSpec; token-type gather is a small select chain (T is usually 2),
    #    so no MXU push/pop and no (S, T) intermediate.
    tok = tok_ref[...]                                    # (TILE_R, 1) int32
    type_rows = type_ref[...].astype(jnp.float32)         # (T, H)
    tok_emb = jnp.zeros(out_ref.shape, jnp.float32)
    for t in range(n_types):                              # static, tiny
        tok_emb = jnp.where(tok == t, type_rows[t][None, :], tok_emb)
    rest = pos_ref[...].astype(jnp.float32) + tok_emb     # (TILE_R, H)

    # 3) One combined wait: every row copy signals `sem` with H*itemsize bytes, so a
    #    single descriptor sized (tile_r, H) waits for exactly all of them.
    pltpu.make_async_copy(word_hbm.at[pl.ds(0, tile_r)], wbuf, sem).wait()

    emb = wbuf[...].astype(jnp.float32) + rest

    # LayerNorm over hidden (biased variance, eps=1e-12, like torch.nn.LayerNorm).
    mean = jnp.mean(emb, axis=-1, keepdims=True)
    centered = emb - mean
    var = jnp.mean(centered * centered, axis=-1, keepdims=True)
    normed = centered * jax.lax.rsqrt(var + eps)

    # Single dense store of the whole (TILE_R, H) slab.  For real BERT (H >= 128)
    # this is lane-dense; at the toy H=32 the store is partially masked (not worth
    # a relayout at this size).
    out_ref[...] = (normed * gamma_ref[...] + beta_ref[...]).astype(out_ref.dtype)
    # TODO(synk): training-mode dropout (eval mode -> no-op).


def make_bert_embeddings(seq_len: int, hidden: int, *,
                         max_rows_per_tile: int = 512,
                         out_dtype=jnp.float32):
    """Returns forward(input_ids, params, token_type_ids=None) -> (B, S, H)."""

    def forward(input_ids, params, token_type_ids=None):
        B, S = input_ids.shape
        assert S == seq_len
        assert S % 8 == 0, "seq_len must be a multiple of 8 (sublane tiling)"
        if token_type_ids is None:
            token_type_ids = jnp.zeros_like(input_ids)

        word = jnp.asarray(params["word_embeddings"])        # (V, H) -> stays in HBM
        pos = jnp.asarray(params["position_embeddings"])     # (P, H), P >= S
        typ = jnp.asarray(params["token_type_embeddings"])   # (T, H)
        gamma = jnp.asarray(params["ln_gamma"]).reshape(1, hidden).astype(jnp.float32)
        beta = jnp.asarray(params["ln_beta"]).reshape(1, hidden).astype(jnp.float32)

        V = word.shape[0]
        T = typ.shape[0]
        rows = B * S

        # ---- row tiling over the flattened (B*S, H) output ----------------------
        if S <= max_rows_per_tile:
            # A tile spans k whole sequences (k | B): positions just repeat k times,
            # so the position operand is a constant (tile_r, H) slab.
            k = 1
            for d in range(B, 0, -1):
                if B % d == 0 and d * S <= max_rows_per_tile:
                    k = d
                    break
            tile_r = k * S
            pos_op = jnp.tile(pos[:S], (k, 1))                          # (tile_r, H)
            pos_spec = pl.BlockSpec((tile_r, hidden), lambda i, ids: (0, 0))
        else:
            # A tile is a sub-strip of one sequence (tile_r | S): position block
            # index cycles through the sequence.
            tile_r = 8
            start = max_rows_per_tile - max_rows_per_tile % 8
            for t in range(start, 7, -8):
                if S % t == 0:
                    tile_r = t
                    break
            tiles_per_seq = S // tile_r
            pos_op = pos
            pos_spec = pl.BlockSpec((tile_r, hidden),
                                    lambda i, ids: (i % tiles_per_seq, 0))

        num_tiles = rows // tile_r
        assert V >= tile_r, "combined DMA wait descriptor requires vocab >= tile_r"

        ids_flat = input_ids.reshape(rows).astype(jnp.int32)   # scalar prefetch -> SMEM
        tok2d = token_type_ids.reshape(rows, 1).astype(jnp.int32)

        kernel = functools.partial(_bert_embeddings_kernel,
                                   tile_r=tile_r, n_types=T, eps=1e-12)

        out = pl.pallas_call(
            kernel,
            out_shape=jax.ShapeDtypeStruct((rows, hidden), out_dtype),
            grid_spec=pltpu.PrefetchScalarGridSpec(
                num_scalar_prefetch=1,
                grid=(num_tiles,),
                in_specs=[
                    pl.BlockSpec((tile_r, 1), lambda i, ids: (i, 0)),   # token_type ids
                    pl.BlockSpec(memory_space=pl.ANY),                  # word table (HBM)
                    pos_spec,                                           # position rows
                    pl.BlockSpec((T, hidden), lambda i, ids: (0, 0)),   # type table (tiny)
                    pl.BlockSpec((1, hidden), lambda i, ids: (0, 0)),   # LN gamma
                    pl.BlockSpec((1, hidden), lambda i, ids: (0, 0)),   # LN beta
                ],
                out_specs=pl.BlockSpec((tile_r, hidden), lambda i, ids: (i, 0)),
                scratch_shapes=[
                    pltpu.VMEM((tile_r, hidden), word.dtype),           # gathered rows
                    pltpu.SemaphoreType.DMA,                            # gather sem
                ],
            ),
            compiler_params=pltpu.CompilerParams(
                dimension_semantics=("parallel",),
                # VMEM footprint is now tiny (no table residency); 32 MiB is safe on
                # v5e/v6e/v7x.  Raise toward ~96 MiB on 128-MiB parts if you also
                # raise max_rows_per_tile.
                vmem_limit_bytes=32 * 1024 * 1024,
            ),
        )(ids_flat, tok2d, word, pos_op, typ, gamma, beta)

        return out.reshape(B, S, hidden)

    return forward


def reference(input_ids, token_type_ids, params, eps=1e-12):
    """Pure-JAX reference matching the PyTorch BertEmbeddings forward (eval mode)."""
    S = input_ids.shape[1]
    word = params["word_embeddings"]
    pos = params["position_embeddings"]
    typ = params["token_type_embeddings"]
    gamma = params["ln_gamma"]
    beta = params["ln_beta"]

    emb = word[input_ids] + pos[jnp.arange(S)][None, :, :] + typ[token_type_ids]
    mean = emb.mean(axis=-1, keepdims=True)
    var = ((emb - mean) ** 2).mean(axis=-1, keepdims=True)
    return (emb - mean) / jnp.sqrt(var + eps) * gamma + beta


if __name__ == "__main__":
    # Small config consistent with the module: hidden_size=32, seq=8, batch=2,
    # vocab_size=128, max_position_embeddings=64, type_vocab_size=2.
    B, S, H = 2, 8, 32
    V, P, T = 128, 64, 2

    key = jax.random.PRNGKey(0)
    k_ids, k_tok, k_w, k_p, k_t, k_g, k_b = jax.random.split(key, 7)

    input_ids = jax.random.randint(k_ids, (B, S), 0, V, dtype=jnp.int32)
    token_type_ids = jax.random.randint(k_tok, (B, S), 0, T, dtype=jnp.int32)

    # DMA row gather is exact for any dtype -> plain f32 tables, no bf16 trickery.
    params = {
        "word_embeddings": 0.02 * jax.random.normal(k_w, (V, H), jnp.float32),
        "position_embeddings": 0.02 * jax.random.normal(k_p, (P, H), jnp.float32),
        "token_type_embeddings": 0.02 * jax.random.normal(k_t, (T, H), jnp.float32),
        "ln_gamma": 1.0 + 0.1 * jax.random.normal(k_g, (H,), jnp.float32),
        "ln_beta": 0.1 * jax.random.normal(k_b, (H,), jnp.float32),
    }

    bert_embeddings = make_bert_embeddings(S, H)
    out = jax.block_until_ready(bert_embeddings(input_ids, params, token_type_ids))

    ref = reference(input_ids, token_type_ids, params)
    np.testing.assert_allclose(np.asarray(out), np.asarray(ref), rtol=1e-5, atol=1e-5)

    print("KERNEL_OK")
</pallas_src>

<mosaic_0001>
module attributes {stable_mosaic.version = 11 : i64} {
  func.func @_bert_embeddings_kernel(%arg0: i32, %arg1: memref<16xi32, #tpu.memory_space<smem>>, %arg2: memref<16x1xi32, #tpu.memory_space<vmem>>, %arg3: memref<128x32xf32, #tpu.memory_space<any>>, %arg4: memref<16x32xf32, #tpu.memory_space<vmem>>, %arg5: memref<2x32xf32, #tpu.memory_space<vmem>>, %arg6: memref<1x32xf32, #tpu.memory_space<vmem>>, %arg7: memref<1x32xf32, #tpu.memory_space<vmem>>, %arg8: memref<16x32xf32, #tpu.memory_space<vmem>>, %arg9: memref<16x32xf32, #tpu.memory_space<vmem>>, %arg10: memref<!tpu.dma_semaphore, #tpu.memory_space<semaphore_mem>>) attributes {dimension_semantics = [#tpu.dimension_semantics<parallel>], iteration_bounds = array<i64: 1>, scalar_prefetch = 1 : i64, scratch_operands = 2 : i64, tpu.core_type = #tpu.core_type<tc>, window_params = [{transform_indices = @transform_0, window_bounds = array<i64: 16, 1>}, {}, {pipeline_mode = #tpu.pipeline_mode<synchronous>, transform_indices = @transform_2, window_bounds = array<i64: 16, 32>}, {pipeline_mode = #tpu.pipeline_mode<synchronous>, transform_indices = @transform_3, window_bounds = array<i64: 2, 32>}, {pipeline_mode = #tpu.pipeline_mode<synchronous>, transform_indices = @transform_4, window_bounds = array<i64: 1, 32>}, {pipeline_mode = #tpu.pipeline_mode<synchronous>, transform_indices = @transform_5, window_bounds = array<i64: 1, 32>}, {transform_indices = @transform_6, window_bounds = array<i64: 16, 32>}]} {
    %c16_i32 = arith.constant 16 : i32
    %0 = arith.muli %arg0, %c16_i32 : i32
    %c0_i32 = arith.constant 0 : i32
    %c16_i32_0 = arith.constant 16 : i32
    %1 = arith.addi %c0_i32, %c16_i32_0 : i32
    %c1_i32 = arith.constant 1 : i32
    scf.for %arg11 = %c0_i32 to %1 step %c1_i32  : i32 {
      %c1_i32_24 = arith.constant 1 : i32
      %53 = arith.muli %arg11, %c1_i32_24 : i32
      %c0_i32_25 = arith.constant 0 : i32
      %54 = arith.addi %c0_i32_25, %53 : i32
      %55 = arith.addi %0, %54 : i32
      %56 = arith.index_cast %55 : i32 to index
      %57 = memref.load %arg1[%56] : memref<16xi32, #tpu.memory_space<smem>>
      %c0_i32_26 = arith.constant 0 : i32
      %58 = tpu.memref_slice %arg3[%57, %c0_i32_26] : memref<128x32xf32, #tpu.memory_space<any>> -> memref<1x32xf32, #tpu.memory_space<any>>
      %c0_i32_27 = arith.constant 0 : i32
      %59 = tpu.memref_slice %arg9[%54, %c0_i32_27] : memref<16x32xf32, #tpu.memory_space<vmem>> -> memref<1x32xf32, #tpu.memory_space<vmem>>
      tpu.enqueue_dma source(%58 : memref<1x32xf32, #tpu.memory_space<any>>) target(%59 : memref<1x32xf32, #tpu.memory_space<vmem>>) target_semaphore(%arg10 : memref<!tpu.dma_semaphore, #tpu.memory_space<semaphore_mem>>)
    }
    %c16_i32_1 = arith.constant 16 : i32
    %c0 = arith.constant 0 : index
    %c0_2 = arith.constant 0 : index
    %2 = vector.load %arg2[%c0, %c0_2] : memref<16x1xi32, #tpu.memory_space<vmem>>, vector<16x1xi32>
    %c0_3 = arith.constant 0 : index
    %c0_4 = arith.constant 0 : index
    %3 = vector.load %arg5[%c0_3, %c0_4] : memref<2x32xf32, #tpu.memory_space<vmem>>, vector<2x32xf32>
    %cst = arith.constant 0.000000e+00 : f32
    %4 = vector.broadcast %cst : f32 to vector<16x32xf32>
    %c0_i32_5 = arith.constant 0 : i32
    %5 = vector.broadcast %c0_i32_5 : i32 to vector<16x1xi32>
    %6 = arith.cmpi eq, %2, %5 : vector<16x1xi32>
    %7 = vector.extract_strided_slice %3 {offsets = [0, 0], sizes = [1, 32], strides = [1, 1]} : vector<2x32xf32> to vector<1x32xf32>
    %8 = vector.shape_cast %7 : vector<1x32xf32> to vector<32xf32>
    %9 = vector.shape_cast %8 : vector<32xf32> to vector<1x32xf32>
    %10 = vector.shape_cast %6 : vector<16x1xi1> to vector<16x1xi1>
    %11 = vector.broadcast %10 : vector<16x1xi1> to vector<16x32xi1>
    %12 = vector.shape_cast %9 : vector<1x32xf32> to vector<1x32xf32>
    %13 = vector.broadcast %12 : vector<1x32xf32> to vector<16x32xf32>
    %14 = arith.select %11, %13, %4 : vector<16x32xi1>, vector<16x32xf32>
    %c1_i32_6 = arith.constant 1 : i32
    %15 = vector.broadcast %c1_i32_6 : i32 to vector<16x1xi32>
    %16 = arith.cmpi eq, %2, %15 : vector<16x1xi32>
    %17 = vector.extract_strided_slice %3 {offsets = [1, 0], sizes = [1, 32], strides = [1, 1]} : vector<2x32xf32> to vector<1x32xf32>
    %18 = vector.shape_cast %17 : vector<1x32xf32> to vector<32xf32>
    %19 = vector.shape_cast %18 : vector<32xf32> to vector<1x32xf32>
    %20 = vector.shape_cast %16 : vector<16x1xi1> to vector<16x1xi1>
    %21 = vector.broadcast %20 : vector<16x1xi1> to vector<16x32xi1>
    %22 = vector.shape_cast %19 : vector<1x32xf32> to vector<1x32xf32>
    %23 = vector.broadcast %22 : vector<1x32xf32> to vector<16x32xf32>
    %24 = arith.select %21, %23, %14 : vector<16x32xi1>, vector<16x32xf32>
    %c0_7 = arith.constant 0 : index
    %c0_8 = arith.constant 0 : index
    %25 = vector.load %arg4[%c0_7, %c0_8] : memref<16x32xf32, #tpu.memory_space<vmem>>, vector<16x32xf32>
    %26 = arith.addf %25, %24 : vector<16x32xf32>
    %c0_i32_9 = arith.constant 0 : i32
    %c0_i32_10 = arith.constant 0 : i32
    %27 = tpu.memref_slice %arg3[%c0_i32_9, %c0_i32_10] : memref<128x32xf32, #tpu.memory_space<any>> -> memref<16x32xf32, #tpu.memory_space<any>>
    tpu.wait_dma2 semaphore(%arg10 : memref<!tpu.dma_semaphore, #tpu.memory_space<semaphore_mem>>) src(%27 : memref<16x32xf32, #tpu.memory_space<any>>) dst(%arg9 : memref<16x32xf32, #tpu.memory_space<vmem>>)
    %c0_11 = arith.constant 0 : index
    %c0_12 = arith.constant 0 : index
    %28 = vector.load %arg9[%c0_11, %c0_12] : memref<16x32xf32, #tpu.memory_space<vmem>>, vector<16x32xf32>
    %29 = arith.addf %28, %26 : vector<16x32xf32>
    %cst_13 = arith.constant dense<0.000000e+00> : vector<16xf32>
    %30 = vector.multi_reduction <add>, %29, %cst_13 [1] : vector<16x32xf32> to vector<16xf32>
    %31 = vector.shape_cast %30 : vector<16xf32> to vector<16x1xf32>
    %cst_14 = arith.constant 3.200000e+01 : f32
    %32 = vector.broadcast %cst_14 : f32 to vector<16x1xf32>
    %33 = arith.divf %31, %32 : vector<16x1xf32>
    %34 = vector.broadcast %33 : vector<16x1xf32> to vector<16x32xf32>
    %35 = arith.subf %29, %34 : vector<16x32xf32>
    %36 = arith.mulf %35, %35 : vector<16x32xf32>
    %cst_15 = arith.constant dense<0.000000e+00> : vector<16xf32>
    %37 = vector.multi_reduction <add>, %36, %cst_15 [1] : vector<16x32xf32> to vector<16xf32>
    %38 = vector.shape_cast %37 : vector<16xf32> to vector<16x1xf32>
    %cst_16 = arith.constant 3.200000e+01 : f32
    %39 = vector.broadcast %cst_16 : f32 to vector<16x1xf32>
    %40 = arith.divf %38, %39 : vector<16x1xf32>
    %cst_17 = arith.constant 9.99999996E-13 : f32
    %41 = vector.broadcast %cst_17 : f32 to vector<16x1xf32>
    %42 = arith.addf %40, %41 : vector<16x1xf32>
    %43 = math.rsqrt %42 : vector<16x1xf32>
    %44 = vector.broadcast %43 : vector<16x1xf32> to vector<16x32xf32>
    %45 = arith.mulf %35, %44 : vector<16x32xf32>
    %c0_18 = arith.constant 0 : index
    %c0_19 = arith.constant 0 : index
    %46 = vector.load %arg6[%c0_18, %c0_19] : memref<1x32xf32, #tpu.memory_space<vmem>>, vector<1x32xf32>
    %47 = vector.broadcast %46 : vector<1x32xf32> to vector<16x32xf32>
    %48 = arith.mulf %45, %47 : vector<16x32xf32>
    %c0_20 = arith.constant 0 : index
    %c0_21 = arith.constant 0 : index
    %49 = vector.load %arg7[%c0_20, %c0_21] : memref<1x32xf32, #tpu.memory_space<vmem>>, vector<1x32xf32>
    %50 = vector.broadcast %49 : vector<1x32xf32> to vector<16x32xf32>
    %51 = arith.addf %48, %50 : vector<16x32xf32>
    %c0_22 = arith.constant 0 : index
    %c0_23 = arith.constant 0 : index
    %52 = vector.load %arg8[%c0_22, %c0_23] : memref<16x32xf32, #tpu.memory_space<vmem>>, vector<16x32xf32>
    tpu.vector_store %arg8[%c0_22, %c0_23], %51 {strides = array<i32>} : memref<16x32xf32, #tpu.memory_space<vmem>>, vector<16x32xf32>,
    return
  }
  func.func @transform_0(%arg0: i32, %arg1: memref<16xi32, #tpu.memory_space<smem>>) -> (i32, i32) {
    %c0_i32 = arith.constant 0 : i32
    %c0_i32_0 = arith.constant 0 : i32
    return %arg0, %c0_i32 : i32, i32
  }
  func.func @transform_2(%arg0: i32, %arg1: memref<16xi32, #tpu.memory_space<smem>>) -> (i32, i32) {
    %c0_i32 = arith.constant 0 : i32
    %c0_i32_0 = arith.constant 0 : i32
    %c0_i32_1 = arith.constant 0 : i32
    return %c0_i32, %c0_i32_0 : i32, i32
  }
  func.func @transform_3(%arg0: i32, %arg1: memref<16xi32, #tpu.memory_space<smem>>) -> (i32, i32) {
    %c0_i32 = arith.constant 0 : i32
    %c0_i32_0 = arith.constant 0 : i32
    %c0_i32_1 = arith.constant 0 : i32
    return %c0_i32, %c0_i32_0 : i32, i32
  }
  func.func @transform_4(%arg0: i32, %arg1: memref<16xi32, #tpu.memory_space<smem>>) -> (i32, i32) {
    %c0_i32 = arith.constant 0 : i32
    %c0_i32_0 = arith.constant 0 : i32
    %c0_i32_1 = arith.constant 0 : i32
    return %c0_i32, %c0_i32_0 : i32, i32
  }
  func.func @transform_5(%arg0: i32, %arg1: memref<16xi32, #tpu.memory_space<smem>>) -> (i32, i32) {
    %c0_i32 = arith.constant 0 : i32
    %c0_i32_0 = arith.constant 0 : i32
    %c0_i32_1 = arith.constant 0 : i32
    return %c0_i32, %c0_i32_0 : i32, i32
  }
  func.func @transform_6(%arg0: i32, %arg1: memref<16xi32, #tpu.memory_space<smem>>) -> (i32, i32) {
    %c0_i32 = arith.constant 0 : i32
    %c0_i32_0 = arith.constant 0 : i32
    return %arg0, %c0_i32 : i32, i32
  }
}

</mosaic_0001>

<bundles_post_ra>
// kernel: tpu_custom_call.1
= control target key start
LH: loop header
LB: loop body
LE: loop exit
PB: predicated region body
PF: predicated region fallthrough
CT: control target
= control target key end

     0   :  { %s381_s0 = inlined_call_operand.vmem [shape: s32[16], index: 0, kind: input, shape index: {}]   ;;  %s382_s1 = inlined_call_operand.vmem [shape: s32[16,1], index: 1, kind: input, shape index: {}]   ;;  %s383_s2 = inlined_call_operand.vmem [shape: f32[128,32], index: 2, kind: input, shape index: {}]   ;;  %s384_s3 = inlined_call_operand.vmem [shape: f32[16,32], index: 3, kind: input, shape index: {}]   ;;  %s385_s4 = inlined_call_operand.vmem [shape: f32[2,32], index: 4, kind: input, shape index: {}]   ;;  %s386_s5 = inlined_call_operand.vmem [shape: f32[1,32], index: 5, kind: input, shape index: {}]   ;;  %s387_s6 = inlined_call_operand.vmem [shape: f32[1,32], index: 6, kind: input, shape index: {}]   ;;  %s388_s7 = inlined_call_operand.hbm [shape: f32[16,32], index: 7, kind: output, shape index: {}]  }
   0x1   :  { %s12_s26 = sshll.u32 %s381_s0, 4  ;;  %s13_s26 = int_to_ptr.vmem [resolvable:$true] %s12_s26 }
   0x2   :  { %s243_s27 = scalar_lea.vmem %s13_s26, 16  ;;  %p248_p1 = scmp.lt.s32.totalorder %s13_s26, %s13_s26 }
   0x3   :  { %p244_p0 = scmp.ne.s32.totalorder %s13_s26, %s243_s27  ;;  %p249_p2 = scmp.lt.s32.totalorder %s243_s27, %s243_s27 }
   0x5   :  { %p250_p3 = por %p249_p2, %p248_p1 }
   0x7   :  { %p251_p4 = pnand %p250_p3, %p244_p0 }
   0x9   :  { %254 = shalt.err (!%p251_p4)  }
   0xa   :  { %s291_s28 = smov [#allocation5]  }
   0xb   :  { %15 = dma.vmem_to_smem %s13_s26, 16, %s291_s28, [#allocation4] }
   0xc   :  { %281 = dma.done.wait [#allocation4], 16 }
   0xd   :  { %282 = vsyncadd [#allocation4], 4294967280 }
   0xe   :  { %17 = sfence }
   0xf   :  { %18 = vsyncpa [#allocation7], 0  ;;  %s287_s29 = smov 0  }
  0x10 LB: > { %s37_s30 = sld [smem:[#allocation5 + %s289_s29]]  ;;  %s39_s10 = scalar_lea.vmem [#allocation2], %s289_s29  ;;  %s289_s29 = sphi %s287_s29, %s35_s29  }
  0x16   : > { %s38_s9 = scalar_lea.vmem %s383_s2, %s37_s30 }
  0x17   : > { %v57_v0 = vld [vmem:[%s38_s9] sm:$0x1] }
  0x18   : > { %58 = vst [vmem:[%s39_s10] sm:$0x1] %v57_v0 }
  0x19   : > { %83 = vsyncadd [#allocation3], 16  ;;  %s35_s29 = sadd.s32 1, %s289_s29  }
  0x1a   : > { %p32_p5 = scmp.ge.s32.totalorder %s35_s29, 16  }
  0x1b   :  { %v84_v1 = vld [vmem:[%s382_s1] sm:$0xff] (%p32_p5)  ;;  %v85_v2 = vld [vmem:[%s382_s1 + $0x8] sm:$0xff] (%p32_p5)  ;;  %v292_v3 = vmov (%p32_p5), 0   ;;  %v99_v8 = vlaneseq (%p32_p5) }
  0x1c   :  { %34 = sbr.rel (!%p32_p5) target bundleno = 16 (0x10), region = 89  ;;  %238 = vset.pattern.permute.xlu1 (%p32_p5), %v292_v3  ;;  %237 = vset.pattern.permute.xlu0 (%p32_p5), %v292_v3  ;;  %vm105_vm0 = vcmp.eq.s32.totalorder (%p32_p5), %v84_v1, 1  ;;  %vm87_vm1 = vcmp.eq.s32.totalorder (%p32_p5), %v84_v1, 0  ;;  %vm106_vm2 = vcmp.eq.s32.totalorder (%p32_p5), %v85_v2, 1  ;;  %vm88_vm3 = vcmp.eq.s32.totalorder (%p32_p5), %v85_v2, 0  ;;  %v123_v17 = vld [vmem:[%s384_s3] sm:$0xff] (%p32_p5) }
  0x1d   :  { %v107_v4 = vsel (%p32_p5), %vm105_vm0, 1, %v292_v3  ;;  %v89_v5 = vsel (%p32_p5), %vm87_vm1, 1, %v292_v3  ;;  %v108_v6 = vsel (%p32_p5), %vm106_vm2, 1, %v292_v3  ;;  %v90_v7 = vsel (%p32_p5), %vm88_vm3, 1, %v292_v3  ;;  %v86_v11 = vld [vmem:[%s385_s4] sm:$0x3] (%p32_p5) }
  0x1e   :  { %110 = vperm.xlu1 (%p32_p5), %238, %v107_v4   ;;  %92 = vperm.xlu0 (%p32_p5), %237, %v89_v5   ;;  %v100_v9 = vshrl.u32 (%p32_p5), %v99_v8, 7  ;;  %v124_v23 = vld [vmem:[%s384_s3 + $0x8] sm:$0xff] (%p32_p5) }
  0x20   :  { %v101_v10 = vsub.s32 (%p32_p5), 0, %v100_v9  ;;  %v119_v12 = vsub.s32 (%p32_p5), 1, %v100_v9 }
  0x22   :  { %113 = vperm.xlu1 (%p32_p5), %238, %v108_v6   ;;  %95 = vperm.xlu0 (%p32_p5), %237, %v90_v7   ;;  %v102_v13 = vrot.slane (%p32_p5), %v86_v11, %v101_v10  ;;  %v120_v14 = vrot.slane (%p32_p5), %v86_v11, %v119_v12 }
  0x9d   :  { %v111_v15 = vpop.permute.xlu1 %110  ;;  %v93_v16 = vpop.permute.xlu0 %92 }
  0x9e   :  { %vm115_vm4 = vcmp.eq.s32.totalorder %v111_v15, 1  ;;  %vm97_vm5 = vcmp.eq.s32.totalorder %v93_v16, 1 }
  0x9f   :  { %v103_v18 = vsel %vm97_vm5, %v102_v13, 0.0 }
  0xa0   :  { %v121_v19 = vsel %vm115_vm4, %v120_v14, %v103_v18 }
  0xa1   :  { %v125_v20 = vadd.f32 %v123_v17, %v121_v19  ;;  %v114_v21 = vpop.permute.xlu1 %113  ;;  %v96_v22 = vpop.permute.xlu0 %95 }
  0xa2   :  { %vm116_vm6 = vcmp.eq.s32.totalorder %v114_v21, 1  ;;  %vm98_vm7 = vcmp.eq.s32.totalorder %v96_v22, 1 }
  0xa3   :  { %v104_v24 = vsel %vm98_vm7, %v102_v13, 0.0 }
  0xa4   :  { %v122_v25 = vsel %vm116_vm6, %v120_v14, %v104_v24 }
  0xa5   :  { %v126_v26 = vadd.f32 %v124_v23, %v122_v25 }
  0xa6   :  { %283 = dma.done.wait [#allocation3], 256 }
  0xa7   :  { %284 = vsyncadd [#allocation3], 4294967040  ;;  %v130_v27 = vld [vmem:[#allocation2] sm:$0xff]  ;;  %vm134_vm8 = vcmask 261120   ;;  %v131_v28 = vld [vmem:[#allocation2 + $0x8] sm:$0xff]  ;;  %s293_s21 = smov [#allocation6]  }
  0xa8   :  { %v132_v29 = vadd.f32 %v130_v27, %v125_v20  ;;  %v133_v30 = vadd.f32 %v131_v28, %v126_v26  ;;  %v221_v50 = vld [vmem:[%s386_s5] ss:$0 sm:$0xff]  ;;  %s187_s22 = sshll.u32 %s293_s21, 4  ;;  %s188_s22 = int_to_ptr.vmem [resolvable:$true] %s187_s22 }
  0xa9   :  { %v222_v52 = vld [vmem:[%s387_s6] ss:$0 sm:$0xff]  ;;  %s255_s23 = scalar_lea.vmem %s188_s22, 256  ;;  %p260_p7 = scmp.lt.s32.totalorder %s188_s22, %s188_s22 }
  0xaa   :  { %v135_v31 = vsel %vm134_vm8, %v132_v29, 0.0  ;;  %v138_v32 = vsel %vm134_vm8, %v133_v30, 0.0  ;;  %p256_p6 = scmp.ne.s32.totalorder %s188_s22, %s255_s23  ;;  %p261_p8 = scmp.lt.s32.totalorder %s255_s23, %s255_s23 }
  0xab   :  { %136 = vadd.xlane.f32.xlu0 %v135_v31 }
  0xac   :  { %p262_p9 = por %p261_p8, %p260_p7 }
  0xae   :  { %p263_p10 = pnand %p262_p9, %p256_p6 }
  0xaf   :  { %139 = vadd.xlane.f32.xlu0 %v138_v32 }
 0x138   :  { %v137_v33 = vpop.xlane.xlu0 %136 }
 0x139   :  { %v142_v34 = vmul.f32 0.03125, %v137_v33 }
 0x13b   :  { %v144_v35 = vsub.f32 %v132_v29, %v142_v34 }
 0x13c   :  { %v140_v36 = vpop.xlane.xlu0 %139 }
 0x13d   :  { %v143_v37 = vmul.f32 0.03125, %v140_v36  ;;  %v146_v38 = vmul.f32 %v144_v35, %v144_v35 }
 0x13f   :  { %v145_v39 = vsub.f32 %v133_v30, %v143_v37  ;;  %v148_v40 = vsel %vm134_vm8, %v146_v38, 0.0 }
 0x140   :  { %149 = vadd.xlane.f32.xlu1 %v148_v40 }
 0x141   :  { %v147_v41 = vmul.f32 %v145_v39, %v145_v39 }
 0x143   :  { %v151_v42 = vsel %vm134_vm8, %v147_v41, 0.0 }
 0x144   :  { %152 = vadd.xlane.f32.xlu1 %v151_v42 }
 0x1cd   :  { %v150_v43 = vpop.xlane.xlu1 %149 }
 0x1ce   :  { %v154_v44 = vmul.f32 0.03125, %v150_v43 }
 0x1d0   :  { %v156_v45 = vadd.f32 1e-12, %v154_v44 }
 0x1d1   :  { %v153_v46 = vpop.xlane.xlu1 %152 }
 0x1d2   :  { %239 = vrsqrt.f32 %v156_v45  ;;  %v155_v47 = vmul.f32 0.03125, %v153_v46 }
 0x1d4   :  { %v157_v48 = vadd.f32 1e-12, %v155_v47 }
 0x1d6   :  { %241 = vrsqrt.f32 %v157_v48 }
 0x1dc   :  { %v240_v49 = vpop.eup %239 }
 0x1dd   :  { %v160_v51 = vmul.f32 %v240_v49, %v144_v35 }
 0x1df   :  { %v169_v53 = vmul.f32 %v221_v50, %v160_v51 }
 0x1e0   :  { %v242_v54 = vpop.eup %241 }
 0x1e1   :  { %v161_v55 = vmul.f32 %v242_v54, %v145_v39  ;;  %v178_v56 = vadd.f32 %v222_v52, %v169_v53 }
 0x1e3   :  { %v170_v57 = vmul.f32 %v221_v50, %v161_v55  ;;  %180 = vst.msk [vmem:[#allocation6] sm:$0xff] %vm134_vm8, %v178_v56 }
 0x1e5   :  { %v179_v58 = vadd.f32 %v222_v52, %v170_v57 }
 0x1e7   :  { %181 = vst.msk [vmem:[#allocation6 + $0x8] sm:$0xff] %vm134_vm8, %v179_v58 }
 0x1e8   :  { %266 = shalt.err (!%p263_p10)
}
 0x1e9   :  { %s267_s24 = scalar_lea.hbm %s388_s7, 256 }
 0x1ea   :  { %p268_p11 = scmp.ne.s32.totalorder %s388_s7, %s267_s24  ;;  %p271_p12 = scmp.lt.u32.totalorder %s267_s24, %s388_s7 }
 0x1ec   :  { %p273_p13 = pnand %p271_p12, %p268_p11 }
 0x1ee   :  { %276 = shalt.err (!%p273_p13)
}
 0x1ef   :  { %s294_s29 = smov 128   ;;  %s295_s30 = smov 8  }
 0x1f0   :  { %193 = dma.vmem_to_hbm [thread:$0]  %s188_s22, 256, %s388_s7, [#allocation7], %s294_s29, %s294_s29, %s295_s30  }
 0x1f1   :  { %285 = dma.done.wait [#allocation7], 256  }
 0x1f2   :  { %286 = vsyncadd [#allocation7], 4294967040 }
 0x1f3   :  { %197 = vsyncpa [#allocation7], 1 }
 0x1f4   :  { %198 = vsyncmov [#allocation3] }
 0x1f7   :  { %s199_s9 = vpop.sfrf %198 }
 0x1f8   :  { %p223_p0 = scmp.ne.s32.totalorder %s199_s9, 0 }
 0x1fa   :  { %203 = shalt.err (%p223_p0)  }

</bundles_post_ra>
